<compile_context>
chip_gen: v5e
topology: v5e:2x2
jax: 0.10.0
libtpu: 0.0.40
codegen_flags: <defaults>
</compile_context>

<pallas_src>
import functools

import jax
import jax.numpy as jnp
from jax.experimental import pallas as pl
from jax.experimental.pallas import tpu as pltpu

LANES = 128
SUBLANES = 8
TILE_ROWS = 1024  # 1024 x 128 f32 = 512 KiB per input block (~85%+ of HBM roofline)


def _dice_partial_kernel(x_ref, t_ref, inter_ref, den_ref, *, n_valid, needs_mask):
    """One grid step: reduce a (tile_rows, 128) block to (8, 128) partial sums.

    inter_ref[i] <- per-(sublane, lane) partial of sigmoid(x) * t
    den_ref[i]   <- per-(sublane, lane) partial of sigmoid(x) + t
    Pure VPU adds; no in-kernel cross-lane reduction, no carried state.
    """
    tile_rows, lanes = x_ref.shape

    x = x_ref[...].astype(jnp.float32)
    t = t_ref[...].astype(jnp.float32)
    s = jax.nn.sigmoid(x)

    inter = s * t
    den = s + t

    if needs_mask:
        # Mask out (a) the <=1023 zero-pad elements and (b) any rows of the final
        # block that lie past the end of the (rows, 128) slab (their contents are
        # unspecified; jnp.where is NaN/Inf-safe for the unselected branch).
        i = pl.program_id(0)
        row_ids = jax.lax.broadcasted_iota(jnp.int32, (tile_rows, lanes), 0)
        col_ids = jax.lax.broadcasted_iota(jnp.int32, (tile_rows, lanes), 1)
        gidx = (i * tile_rows + row_ids) * lanes + col_ids
        valid = gidx < n_valid
        inter = jnp.where(valid, inter, 0.0)
        den = jnp.where(valid, den, 0.0)

    g = tile_rows // SUBLANES
    inter_ref[...] = jnp.sum(inter.reshape(g, SUBLANES, lanes), axis=0)[None]
    den_ref[...] = jnp.sum(den.reshape(g, SUBLANES, lanes), axis=0)[None]


def dice_loss(inputs, targets, smooth=1.0):
    """Pallas implementation of DiceLoss.forward (matches the PyTorch module)."""
    x = inputs.reshape(-1)   # keep original dtype -> minimal HBM traffic
    t = targets.reshape(-1)
    n = x.shape[0]

    # Round the flat length up to a multiple of 8*128 so the (rows, 128) view has
    # sublane-aligned rows. For typical NCHW sizes this is a no-op (free reshape);
    # otherwise at most 1023 elements are padded (values are masked in-kernel).
    chunk = SUBLANES * LANES
    n_pad = pl.cdiv(n, chunk) * chunk
    if n_pad != n:
        x = jnp.pad(x, (0, n_pad - n))
        t = jnp.pad(t, (0, n_pad - n))

    rows = n_pad // LANES
    tile_rows = min(TILE_ROWS, rows)
    num_blocks = pl.cdiv(rows, tile_rows)
    needs_mask = (num_blocks * tile_rows * LANES) != n

    kernel = functools.partial(_dice_partial_kernel, n_valid=n, needs_mask=needs_mask)

    partial_shape = jax.ShapeDtypeStruct((num_blocks, SUBLANES, LANES), jnp.float32)
    inter_p, den_p = pl.pallas_call(
        kernel,
        out_shape=(partial_shape, partial_shape),
        grid_spec=pltpu.PrefetchScalarGridSpec(
            num_scalar_prefetch=0,
            grid=(num_blocks,),
            in_specs=[
                pl.BlockSpec((tile_rows, LANES), lambda i: (i, 0)),
                pl.BlockSpec((tile_rows, LANES), lambda i: (i, 0)),
            ],
            out_specs=[
                pl.BlockSpec((1, SUBLANES, LANES), lambda i: (i, 0, 0)),
                pl.BlockSpec((1, SUBLANES, LANES), lambda i: (i, 0, 0)),
            ],
        ),
        compiler_params=pltpu.CompilerParams(
            # No carried state -> grid can be sharded across TensorCores (v7x).
            dimension_semantics=("parallel",),
        ),
    )(x.reshape(rows, LANES), t.reshape(rows, LANES))

    # Tiny final reduction + dice formula in plain JAX (f32 throughout).
    intersection = jnp.sum(inter_p)
    denom = jnp.sum(den_p)
    dice = (2.0 * intersection + smooth) / (denom + smooth)
    return 1.0 - dice


def dice_loss_ref(inputs, targets, smooth=1.0):
    """Pure-JAX reference mirroring the PyTorch forward."""
    x = jax.nn.sigmoid(inputs.astype(jnp.float32)).reshape(-1)
    t = targets.astype(jnp.float32).reshape(-1)
    inter = jnp.sum(x * t)
    dice = (2.0 * inter + smooth) / (jnp.sum(x) + jnp.sum(t) + smooth)
    return 1.0 - dice


if __name__ == "__main__":
    key = jax.random.PRNGKey(0)
    k1, k2, k3, k4 = jax.random.split(key, 4)

    # Small segmentation-style shapes: logits and binary targets, NCHW.
    inputs = jax.random.normal(k1, (2, 4, 16, 16), dtype=jnp.float32)
    targets = (jax.random.uniform(k2, (2, 4, 16, 16)) > 0.5).astype(jnp.float32)

    loss = jax.block_until_ready(dice_loss(inputs, targets))
    ref = dice_loss_ref(inputs, targets)
    assert jnp.allclose(loss, ref, atol=1e-5, rtol=1e-5), (loss, ref)

    # Ragged size: exercises the in-kernel tail mask path.
    inputs2 = jax.random.normal(k3, (2, 3, 7, 5), dtype=jnp.float32)
    targets2 = (jax.random.uniform(k4, (2, 3, 7, 5)) > 0.5).astype(jnp.float32)
    loss2 = jax.block_until_ready(dice_loss(inputs2, targets2))
    ref2 = dice_loss_ref(inputs2, targets2)
    assert jnp.allclose(loss2, ref2, atol=1e-5, rtol=1e-5), (loss2, ref2)

    print("KERNEL_OK")
</pallas_src>

<mosaic_0001>
module attributes {stable_mosaic.version = 11 : i64} {
  func.func @_dice_partial_kernel(%arg0: i32, %arg1: memref<16x128xf32, #tpu.memory_space<vmem>>, %arg2: memref<16x128xf32, #tpu.memory_space<vmem>>, %arg3: memref<1x8x128xf32, #tpu.memory_space<vmem>>, %arg4: memref<1x8x128xf32, #tpu.memory_space<vmem>>) attributes {dimension_semantics = [#tpu.dimension_semantics<parallel>], iteration_bounds = array<i64: 1>, scalar_prefetch = 0 : i64, scratch_operands = 0 : i64, tpu.core_type = #tpu.core_type<tc>, window_params = [{transform_indices = @transform_0, window_bounds = array<i64: 16, 128>}, {transform_indices = @transform_1, window_bounds = array<i64: 16, 128>}, {transform_indices = @transform_2, window_bounds = array<i64: 1, 8, 128>}, {transform_indices = @transform_3, window_bounds = array<i64: 1, 8, 128>}]} {
    %c0 = arith.constant 0 : index
    %c0_0 = arith.constant 0 : index
    %0 = vector.load %arg1[%c0, %c0_0] : memref<16x128xf32, #tpu.memory_space<vmem>>, vector<16x128xf32>
    %c0_1 = arith.constant 0 : index
    %c0_2 = arith.constant 0 : index
    %1 = vector.load %arg2[%c0_1, %c0_2] : memref<16x128xf32, #tpu.memory_space<vmem>>, vector<16x128xf32>
    %2 = arith.negf %0 : vector<16x128xf32>
    %3 = math.exp %2 : vector<16x128xf32>
    %cst = arith.constant 1.000000e+00 : f32
    %4 = vector.broadcast %cst : f32 to vector<16x128xf32>
    %5 = arith.addf %4, %3 : vector<16x128xf32>
    %6 = arith.divf %4, %5 : vector<16x128xf32>
    %7 = arith.mulf %6, %1 : vector<16x128xf32>
    %8 = arith.addf %6, %1 : vector<16x128xf32>
    %9 = vector.shape_cast %7 : vector<16x128xf32> to vector<2x8x128xf32>
    %cst_3 = arith.constant dense<0.000000e+00> : vector<8x128xf32>
    %10 = vector.multi_reduction <add>, %9, %cst_3 [0] : vector<2x8x128xf32> to vector<8x128xf32>
    %11 = vector.shape_cast %10 : vector<8x128xf32> to vector<1x8x128xf32>
    %c0_4 = arith.constant 0 : index
    %c0_5 = arith.constant 0 : index
    %c0_6 = arith.constant 0 : index
    %12 = vector.load %arg3[%c0_4, %c0_5, %c0_6] : memref<1x8x128xf32, #tpu.memory_space<vmem>>, vector<1x8x128xf32>
    tpu.vector_store %arg3[%c0_4, %c0_5, %c0_6], %11 {strides = array<i32>} : memref<1x8x128xf32, #tpu.memory_space<vmem>>, vector<1x8x128xf32>,
    %13 = vector.shape_cast %8 : vector<16x128xf32> to vector<2x8x128xf32>
    %cst_7 = arith.constant dense<0.000000e+00> : vector<8x128xf32>
    %14 = vector.multi_reduction <add>, %13, %cst_7 [0] : vector<2x8x128xf32> to vector<8x128xf32>
    %15 = vector.shape_cast %14 : vector<8x128xf32> to vector<1x8x128xf32>
    %c0_8 = arith.constant 0 : index
    %c0_9 = arith.constant 0 : index
    %c0_10 = arith.constant 0 : index
    %16 = vector.load %arg4[%c0_8, %c0_9, %c0_10] : memref<1x8x128xf32, #tpu.memory_space<vmem>>, vector<1x8x128xf32>
    tpu.vector_store %arg4[%c0_8, %c0_9, %c0_10], %15 {strides = array<i32>} : memref<1x8x128xf32, #tpu.memory_space<vmem>>, vector<1x8x128xf32>,
    return
  }
  func.func @transform_0(%arg0: i32) -> (i32, i32) {
    %c0_i32 = arith.constant 0 : i32
    %c0_i32_0 = arith.constant 0 : i32
    return %arg0, %c0_i32 : i32, i32
  }
  func.func @transform_1(%arg0: i32) -> (i32, i32) {
    %c0_i32 = arith.constant 0 : i32
    %c0_i32_0 = arith.constant 0 : i32
    return %arg0, %c0_i32 : i32, i32
  }
  func.func @transform_2(%arg0: i32) -> (i32, i32, i32) {
    %c0_i32 = arith.constant 0 : i32
    %c0_i32_0 = arith.constant 0 : i32
    %c0_i32_1 = arith.constant 0 : i32
    return %arg0, %c0_i32, %c0_i32_0 : i32, i32, i32
  }
  func.func @transform_3(%arg0: i32) -> (i32, i32, i32) {
    %c0_i32 = arith.constant 0 : i32
    %c0_i32_0 = arith.constant 0 : i32
    %c0_i32_1 = arith.constant 0 : i32
    return %arg0, %c0_i32, %c0_i32_0 : i32, i32, i32
  }
}

</mosaic_0001>

<bundles_post_ra>
// kernel: tpu_custom_call.1
= control target key start
LH: loop header
LB: loop body
LE: loop exit
PB: predicated region body
PF: predicated region fallthrough
CT: control target
= control target key end

     0   :  { %9 = vsyncpa [#allocation3], 0  ;;  %s289_s0 = inlined_call_operand.hbm [shape: f32[16,128], index: 0, kind: input, shape index: {}]   ;;  %s290_s1 = inlined_call_operand.hbm [shape: f32[16,128], index: 1, kind: input, shape index: {}]   ;;  %s291_s2 = inlined_call_operand.hbm [shape: f32[1,8,128], index: 2, kind: output, shape index: {0}]   ;;  %s292_s3 = inlined_call_operand.hbm [shape: f32[1,8,128], index: 3, kind: output, shape index: {1}]  }
   0x1   :  { %10 = vsyncpa [#allocation6], 0 }
   0x2   :  { %11 = vsyncpa [#allocation4], 0 }
   0x3   :  { %12 = vsyncpa [#allocation9], 0  ;;  %s17_s14 = sshll.u32 %s289_s0, 4  ;;  %s251_s15 = smov [#allocation2]   ;;  %s18_s14 = int_to_ptr.hbm [resolvable:$true] %s17_s14 }
   0x4   :  { %s19_s16 = sshll.u32 %s251_s15, 4  ;;  %s30_s19 = sshll.u32 %s290_s1, 4  ;;  %s20_s16 = int_to_ptr.vmem [resolvable:$true] %s19_s16  ;;  %s31_s19 = int_to_ptr.hbm [resolvable:$true] %s30_s19 }
   0x5   :  { %s252_s20 = smov 128   ;;  %s253_s21 = smov 8  }
   0x6   :  { %25 = dma.hbm_to_vmem [thread:$0]  %s18_s14, 256, %s20_s16, [#allocation3], %s252_s20, %s252_s20, %s253_s21  }
   0x7   :  { %s254_s22 = smov [#allocation5]  }
   0x8   :  { %s32_s23 = sshll.u32 %s254_s22, 4  ;;  %s33_s23 = int_to_ptr.vmem [resolvable:$true] %s32_s23 }
   0x9   :  { %38 = dma.hbm_to_vmem [thread:$0]  %s31_s19, 256, %s33_s23, [#allocation6], %s252_s20, %s252_s20, %s253_s21  }
   0xa   :  { %243 = dma.done.wait [#allocation3], 256  }
   0xb   :  { %244 = vsyncadd [#allocation3], 4294967040 }
   0xc   :  { %245 = dma.done.wait [#allocation6], 256  }
   0xd   :  { %246 = vsyncadd [#allocation6], 4294967040  ;;  %v47_v0 = vld [vmem:[#allocation2] sm:$0xff]  ;;  %v48_v1 = vld [vmem:[#allocation2 + $0x8] sm:$0xff]  ;;  %s255_s0 = smov [#allocation7]   ;;  %s104_s26 = sshll.u32 %s291_s2, 4  ;;  %s105_s26 = int_to_ptr.hbm [resolvable:$true] %s104_s26 }
   0xe   :  { %v131_v2 = vmul.f32 -1.442695, %v47_v0  ;;  %v132_v3 = vmul.f32 -1.442695, %v48_v1  ;;  %v49_v23 = vld [vmem:[#allocation5] sm:$0xff]  ;;  %v50_v25 = vld [vmem:[#allocation5 + $0x8] sm:$0xff] }
   0xf   :  { %s102_s1 = sshll.u32 %s255_s0, 4  ;;  %s256_s27 = smov [#allocation8]   ;;  %s103_s1 = int_to_ptr.vmem [resolvable:$true] %s102_s1 }
  0x10   :  { %139 = vpow2.f32 %v131_v2  ;;  %s113_s28 = sshll.u32 %s256_s27, 4  ;;  %s115_s4 = sshll.u32 %s292_s3, 4  ;;  %s114_s28 = int_to_ptr.vmem [resolvable:$true] %s113_s28  ;;  %s116_s4 = int_to_ptr.hbm [resolvable:$true] %s115_s4 }
  0x11   :  { %141 = vpow2.f32 %v132_v3 }
  0x16   :  { %v140_v4 = vpop.eup %139 }
  0x17   :  { %v142_v5 = vpop.eup %141  ;;  %v57_v6 = vadd.f32 1.0, %v140_v4 }
  0x18   :  { %v58_v7 = vadd.f32 1.0, %v142_v5 }
  0x19   :  { %143 = vrcp.f32 %v57_v6  ;;  %vm64_vm0 = vweird.f32 %v57_v6  ;;  %v70_v11 = vand.u32 2147483648, %v57_v6  ;;  %v68_v14 = vand.u32 2147483647, %v57_v6 }
  0x1a   :  { %145 = vrcp.f32 %v58_v7  ;;  %v85_v15 = vand.u32 2147483648, %v58_v7  ;;  %vm79_vm2 = vweird.f32 %v58_v7  ;;  %v83_v17 = vand.u32 2147483647, %v58_v7 }
  0x1b   :  { %v71_v19 = vor.u32 1.1754944e-38, %v70_v11  ;;  %vm69_vm5 = vcmp.eq.f32.partialorder %v68_v14, 8.507059e+37 }
  0x1c   :  { %v86_v22 = vor.u32 1.1754944e-38, %v85_v15  ;;  %vm84_vm7 = vcmp.eq.f32.partialorder %v83_v17, 8.507059e+37 }
  0x1f   :  { %v144_v8 = vpop.eup %143 }
  0x20   :  { %v146_v9 = vpop.eup %145  ;;  %v60_v10 = vmul.f32 %v144_v8, %v57_v6  ;;  %vm65_vm1 = vweird.f32 %v144_v8 }
  0x21   :  { %v75_v12 = vmul.f32 %v146_v9, %v58_v7  ;;  %vm80_vm3 = vweird.f32 %v146_v9  ;;  %vm66_vm4 = vmor %vm64_vm0, %vm65_vm1 }
  0x22   :  { %v61_v13 = vsub.f32 1.0, %v60_v10  ;;  %vm81_vm6 = vmor %vm79_vm2, %vm80_vm3 }
  0x23   :  { %v76_v16 = vsub.f32 1.0, %v75_v12 }
  0x24   :  { %v62_v18 = vmul.f32 %v144_v8, %v61_v13 }
  0x25   :  { %v77_v20 = vmul.f32 %v146_v9, %v76_v16 }
  0x26   :  { %v63_v21 = vadd.f32 %v144_v8, %v62_v18 }
  0x27   :  { %v78_v24 = vadd.f32 %v146_v9, %v77_v20 }
  0x28   :  { %v67_v26 = vsel %vm66_vm4, %v144_v8, %v63_v21 }
  0x29   :  { %v72_v27 = vsel %vm69_vm5, %v71_v19, %v67_v26  ;;  %v82_v28 = vsel %vm81_vm6, %v146_v9, %v78_v24 }
  0x2a   :  { %v87_v29 = vsel %vm84_vm7, %v86_v22, %v82_v28  ;;  %v89_v30 = vmul.f32 %v72_v27, %v49_v23  ;;  %v91_v31 = vadd.f32 %v72_v27, %v49_v23 }
  0x2b   :  { %v90_v32 = vmul.f32 %v87_v29, %v50_v25  ;;  %v92_v33 = vadd.f32 %v87_v29, %v50_v25 }
  0x2d   :  { %v93_v34 = vadd.f32 %v90_v32, %v89_v30  ;;  %v95_v35 = vadd.f32 %v92_v33, %v91_v31 }
  0x2f   :  { %94 = vst [vmem:[#allocation7] sm:$0xff] %v93_v34 }
  0x30   :  { %96 = vst [vmem:[#allocation8] sm:$0xff] %v95_v35  ;;  %107 = dma.vmem_to_hbm [thread:$0]  %s103_s1, 128, %s105_s26, [#allocation4]  }
  0x31   :  { %118 = dma.vmem_to_hbm [thread:$0]  %s114_s28, 128, %s116_s4, [#allocation9]  }
  0x32   :  { %247 = dma.done.wait [#allocation4], 128  }
  0x33   :  { %248 = vsyncadd [#allocation4], 4294967168 }
  0x34   :  { %249 = dma.done.wait [#allocation9], 128  }
  0x35   :  { %250 = vsyncadd [#allocation9], 4294967168 }
  0x36   :  { %127 = vsyncpa [#allocation3], 1 }
  0x37   :  { %128 = vsyncpa [#allocation6], 1 }
  0x38   :  { %129 = vsyncpa [#allocation4], 1 }
  0x39   :  { %130 = vsyncpa [#allocation9], 1 }

</bundles_post_ra>
